<compile_context>
chip_gen: v7x
topology: tpu7x:2x2x1
jax: 0.10.0
libtpu: 0.0.40
codegen_flags: <defaults>
</compile_context>

<pallas_src>
import functools

import jax
import jax.numpy as jnp
import numpy as np
from jax import lax
from jax.experimental import pallas as pl
from jax.experimental.pallas import tpu as pltpu


def _round_up(x, m):
    return ((x + m - 1) // m) * m


# ----------------------------- Pallas kernel --------------------------------

def _matmul_bn_act_kernel(act, x_ref, w_ref, shift_ref, o_ref):
    # (O, K) @ (K, tm) on the MXU: bf16 operands, f32 accumulation.
    acc = jnp.dot(w_ref[...], x_ref[...], preferred_element_type=jnp.float32)
    # Folded BN/bias shift (scale is already folded into the weight rows).
    acc = acc + shift_ref[...]
    if act == "relu":
        acc = jnp.maximum(acc, 0.0)
    elif act == "sigmoid":
        acc = jax.nn.sigmoid(acc)
    o_ref[...] = acc.astype(o_ref.dtype)


def _vmem_bytes(tm, K, O):
    K_s = _round_up(K, 16)                       # bf16 sublane packing
    O_s = _round_up(O, 16)
    return (2 * K_s * tm * 2                     # double-buffered bf16 patch tiles
            + 2 * O_s * tm * 2                   # double-buffered bf16 output tiles
            + 2 * O_s * _round_up(K, 128) * 2    # grid-invariant weights (tiny)
            + 2 * _round_up(O, 8) * 128 * 4)     # grid-invariant shift (tiny)


def _choose_tile_m(M, K, O, cap=4096, vmem_budget=12 << 20):
    """Lane-axis (M) tile: multiple of 128, as large as possible under the budget."""
    tm = min(cap, _round_up(M, 128))
    # v7x has 2 TensorCores: make sure the "parallel" M grid has >= 2 tiles when
    # there is enough work to split (no effect on the 1-TC v5e / v6e).
    if M > 256 and _round_up(M, tm) // tm < 2:
        tm = max(128, _round_up((M + 1) // 2, 128))
    while tm > 128 and _vmem_bytes(tm, K, O) > vmem_budget:
        tm = max(128, _round_up(tm // 2, 128))
    return tm


def matmul_bn_act(cols, w_ok, shift_o1, act, out_dtype=jnp.bfloat16):
    """Fused (O,K) @ (K,M) + shift + activation, lane-dense on M, bf16 output.

    cols:     (K, M)   bf16 im2col columns (M = output pixels on lanes)
    w_ok:     (O, K)   bf16 weights with the folded BN scale already applied
    shift_o1: (O, 1)   f32 folded shift = (bias - bn_mean) * bn_scale + bn_beta
    """
    K, M = cols.shape
    O, Kw = w_ok.shape
    assert Kw == K

    tm = _choose_tile_m(M, K, O)
    M_pad = _round_up(M, tm)
    if M_pad != M:
        cols = jnp.pad(cols, ((0, 0), (0, M_pad - M)))

    kernel = functools.partial(_matmul_bn_act_kernel, act)
    out = pl.pallas_call(
        kernel,
        out_shape=jax.ShapeDtypeStruct((O, M_pad), out_dtype),
        grid_spec=pltpu.PrefetchScalarGridSpec(
            num_scalar_prefetch=0,
            grid=(M_pad // tm,),
            in_specs=[
                pl.BlockSpec((K, tm), lambda i: (0, i)),   # im2col columns tile
                pl.BlockSpec((O, K), lambda i: (0, 0)),    # weights (resident, tiny)
                pl.BlockSpec((O, 1), lambda i: (0, 0)),    # folded shift (resident)
            ],
            out_specs=pl.BlockSpec((O, tm), lambda i: (0, i)),
        ),
        compiler_params=pltpu.CompilerParams(
            dimension_semantics=("parallel",),   # M tiles shard across TCs on v7x
            vmem_limit_bytes=32 << 20),          # <= v7x scoped VMEM; tiles are tiny
    )(cols.astype(jnp.bfloat16), w_ok, shift_o1)

    if M_pad != M:
        out = out[:, :M]
    return out


# ------------------------------ im2col glue ---------------------------------

def _patchify_cols(x, p):
    """Non-overlapping patches for Conv2d(kernel=p, stride=p), (K, M) layout.

    x: (B, C, H, W)  ->  ((C*p*p, B*Hp*Wp), (B, Hp, Wp)); row order (c, ki, kj)
    matches conv_w.reshape(O, -1); column order is (b, hp, wp).
    """
    B, C, H, W = x.shape
    Hp, Wp = H // p, W // p
    xp = x.reshape(B, C, Hp, p, Wp, p)
    xp = jnp.transpose(xp, (1, 3, 5, 0, 2, 4))           # (C, p, p, B, Hp, Wp)
    return xp.reshape(C * p * p, B * Hp * Wp), (B, Hp, Wp)


def _im2col_same_cols(x, k):
    """Stride-1 'same' (pad k//2) im2col in (K, M) layout. Only used on a single
    tiny (1, 1, p, p) ones patch (cond-path constant fold), so the k^2 expansion
    never touches a full-size tensor."""
    N, C, H, W = x.shape
    pad = k // 2
    xp = jnp.pad(x, ((0, 0), (0, 0), (pad, pad), (pad, pad)))
    cols = []
    for i in range(k):
        for j in range(k):
            cols.append(xp[:, :, i:i + H, j:j + W])       # (N, C, H, W)
    patches = jnp.stack(cols, axis=2)                     # (N, C, k*k, H, W)
    patches = jnp.transpose(patches, (1, 2, 0, 3, 4))     # (C, k*k, N, H, W)
    return patches.reshape(C * k * k, N * H * W)          # rows (c, ki, kj)


# ------------------------------ CondConv model ------------------------------

class CondConvPallas:
    def __init__(self, in_chans, out_dim, patch_size, cond_c=1, *, key):
        assert patch_size % 2 == 1
        self.patch_size = (patch_size, patch_size)
        self.in_chans = in_chans
        self.out_dim = out_dim
        self.cond_c = cond_c
        p = patch_size
        ks = jax.random.split(key, 6)

        def conv_init(kk, shape, fan_in):
            bound = 1.0 / np.sqrt(fan_in)  # PyTorch Conv2d default init range
            return jax.random.uniform(kk, shape, jnp.float32, -bound, bound)

        # self.conv[0]
        self.conv_w = conv_init(ks[0], (out_dim, in_chans, p, p), in_chans * p * p)
        self.conv_b = conv_init(ks[1], (out_dim,), in_chans * p * p)
        # self.cond_att[0]
        self.att_w = conv_init(ks[2], (out_dim, cond_c, p, p), cond_c * p * p)
        self.att_b = conv_init(ks[3], (out_dim,), cond_c * p * p)
        # self.cond_conv exists in the PyTorch module but is never used in forward().
        self.cond_conv_w = conv_init(ks[4], (out_dim, cond_c, p, p), cond_c * p * p)
        self.cond_conv_b = conv_init(ks[5], (out_dim,), cond_c * p * p)

        # BatchNorm2d params (eval mode; PyTorch defaults). Parameterized so trained
        # running stats / affine params can be dropped in.
        self.bn_eps = 1e-5
        self.bn1_gamma = jnp.ones((out_dim,), jnp.float32)
        self.bn1_beta = jnp.zeros((out_dim,), jnp.float32)
        self.bn1_mean = jnp.zeros((out_dim,), jnp.float32)
        self.bn1_var = jnp.ones((out_dim,), jnp.float32)
        self.bn2_gamma = jnp.ones((out_dim,), jnp.float32)
        self.bn2_beta = jnp.zeros((out_dim,), jnp.float32)
        self.bn2_mean = jnp.zeros((out_dim,), jnp.float32)
        self.bn2_var = jnp.ones((out_dim,), jnp.float32)

        def fold(w4, b, gamma, beta, mean, var):
            scale = gamma / jnp.sqrt(var + self.bn_eps)            # (O,)
            w_folded = w4.reshape(out_dim, -1) * scale[:, None]    # (O, K)
            shift = ((b - mean) * scale + beta).reshape(out_dim, 1)
            return w_folded.astype(jnp.bfloat16), shift.astype(jnp.float32)

        # Main path: (O, K) bf16 weights with BN scale folded in, f32 (O, 1) shift.
        self.w_main_bf, self.shift_main = fold(
            self.conv_w, self.conv_b,
            self.bn1_gamma, self.bn1_beta, self.bn1_mean, self.bn1_var)

        # Cond/attention path: forward() ALWAYS overwrites cond with ones, so every
        # rearranged (1, p, p) patch is identical -> the conv + BN + sigmoid result is
        # a constant (O, p, p) tile. Compute it ONCE here with the same Pallas kernel
        # and cache it; __call__ only broadcasts it.
        w_att_bf, shift_att = fold(
            self.att_w, self.att_b,
            self.bn2_gamma, self.bn2_beta, self.bn2_mean, self.bn2_var)
        ones_cols = _im2col_same_cols(jnp.ones((1, cond_c, p, p), jnp.float32), p)
        a = matmul_bn_act(ones_cols.astype(jnp.bfloat16), w_att_bf, shift_att,
                          act="sigmoid")                           # (O, p*p) bf16
        self.a_opp = a.reshape(out_dim, p, p)                      # cached constant

    def __call__(self, x, cond=None):
        B, C, H, W = x.shape
        p = self.patch_size[0]
        O = self.out_dim

        # --- main path: Conv2d(stride=p) + BN + ReLU as one fused im2col matmul ----
        # Cast to bf16 BEFORE the relayout / pad so XLA moves half the bytes.
        cols, (_, Hp, Wp) = _patchify_cols(x.astype(jnp.bfloat16), p)
        y = matmul_bn_act(cols, self.w_main_bf, self.shift_main, act="relu")
        x_emb = y.reshape(O, B, Hp, Wp).transpose(1, 0, 2, 3)      # (B, O, H/p, W/p)

        # --- cond path: broadcast of the cached constant attention tile (bf16) -----
        hp_, wp_ = H // p, W // p
        cond_att = jnp.broadcast_to(
            self.a_opp[None, :, None, :, None, :], (B, O, hp_, p, wp_, p)
        ).reshape(B, O, H, W)

        # TODO(synk): PyTorch forward() prints shapes then calls exit(); the trailing
        # `return cond_att * x` is unreachable and shape-incompatible
        # ((B,O,H,W) vs (B,O,H/p,W/p)), so we return both computed tensors instead.
        return x_emb, cond_att


# --------------------------- pure-JAX reference ------------------------------

def ref_forward(model, x):
    """Reference with matching bf16-operand / f32-accumulation conv numerics."""
    p = model.patch_size[0]
    O = model.out_dim
    eps = model.bn_eps
    B, C, H, W = x.shape

    s1 = (model.bn1_gamma / jnp.sqrt(model.bn1_var + eps)).reshape(1, O, 1, 1)
    y = lax.conv_general_dilated(
        x.astype(jnp.bfloat16), model.conv_w.astype(jnp.bfloat16),
        window_strides=(p, p), padding="VALID",
        dimension_numbers=("NCHW", "OIHW", "NCHW"),
        preferred_element_type=jnp.float32)
    y = (y + model.conv_b.reshape(1, O, 1, 1)
         - model.bn1_mean.reshape(1, O, 1, 1)) * s1 + model.bn1_beta.reshape(1, O, 1, 1)
    y = jnp.maximum(y, 0.0)

    cond = jnp.ones((B, 1, H, W), jnp.float32)
    w_, h_ = H // p, W // p
    cond_t = cond.reshape(B, 1, w_, p, h_, p).transpose(0, 2, 4, 1, 3, 5)
    cond_t = cond_t.reshape(B * w_ * h_, 1, p, p)
    s2 = (model.bn2_gamma / jnp.sqrt(model.bn2_var + eps)).reshape(1, O, 1, 1)
    a = lax.conv_general_dilated(
        cond_t.astype(jnp.bfloat16), model.att_w.astype(jnp.bfloat16),
        window_strides=(1, 1),
        padding=[(p // 2, p // 2), (p // 2, p // 2)],
        dimension_numbers=("NCHW", "OIHW", "NCHW"),
        preferred_element_type=jnp.float32)
    a = (a + model.att_b.reshape(1, O, 1, 1)
         - model.bn2_mean.reshape(1, O, 1, 1)) * s2 + model.bn2_beta.reshape(1, O, 1, 1)
    a = jax.nn.sigmoid(a)
    a = a.reshape(B, w_, h_, O, p, p).transpose(0, 3, 1, 4, 2, 5)
    a = a.reshape(B, O, w_ * p, h_ * p)
    return y, a


# ------------------------------------ main -----------------------------------

if __name__ == "__main__":
    key = jax.random.PRNGKey(0)
    kx, kp = jax.random.split(key)

    B, C, H, W = 2, 4, 12, 12      # spatial must be divisible by patch_size
    patch_size = 3
    out_dim = 32

    x = jax.random.normal(kx, (B, C, H, W), jnp.float32)
    model = CondConvPallas(C, out_dim, patch_size, cond_c=1, key=kp)

    x_emb, cond_att = model(x)
    jax.block_until_ready((x_emb, cond_att))

    y_ref, a_ref = ref_forward(model, x)
    # Kernel outputs are stored in bf16 (~3 significant decimal digits), so use a
    # correspondingly looser tolerance than the f32 reference.
    np.testing.assert_allclose(np.array(x_emb.astype(jnp.float32)),
                               np.array(y_ref), rtol=1e-2, atol=1e-2)
    np.testing.assert_allclose(np.array(cond_att.astype(jnp.float32)),
                               np.array(a_ref), rtol=1e-2, atol=1e-2)
    print("KERNEL_OK")
</pallas_src>

<mosaic_0001>
module attributes {stable_mosaic.version = 11 : i64} {
  func.func @_matmul_bn_act_kernel(%arg0: i32, %arg1: memref<9x128xbf16, #tpu.memory_space<vmem>>, %arg2: memref<32x9xbf16, #tpu.memory_space<vmem>>, %arg3: memref<32x1xf32, #tpu.memory_space<vmem>>, %arg4: memref<32x128xbf16, #tpu.memory_space<vmem>>) attributes {dimension_semantics = [#tpu.dimension_semantics<parallel>], iteration_bounds = array<i64: 1>, scalar_prefetch = 0 : i64, scratch_operands = 0 : i64, tpu.core_type = #tpu.core_type<tc>, window_params = [{transform_indices = @transform_0, window_bounds = array<i64: 9, 128>}, {pipeline_mode = #tpu.pipeline_mode<synchronous>, transform_indices = @transform_1, window_bounds = array<i64: 32, 9>}, {pipeline_mode = #tpu.pipeline_mode<synchronous>, transform_indices = @transform_2, window_bounds = array<i64: 32, 1>}, {transform_indices = @transform_3, window_bounds = array<i64: 32, 128>}]} {
    %c0 = arith.constant 0 : index
    %c0_0 = arith.constant 0 : index
    %0 = vector.load %arg2[%c0, %c0_0] : memref<32x9xbf16, #tpu.memory_space<vmem>>, vector<32x9xbf16>
    %c0_1 = arith.constant 0 : index
    %c0_2 = arith.constant 0 : index
    %1 = vector.load %arg1[%c0_1, %c0_2] : memref<9x128xbf16, #tpu.memory_space<vmem>>, vector<9x128xbf16>
    %cst = arith.constant dense<0.000000e+00> : vector<32x128xf32>
    %2 = tpu.matmul %0, %1, %cst {dimension_numbers = #tpu.dot_dimension_numbers<[1], [0], [0], [1], [0, 0, 1, 1], [], []>} : vector<32x9xbf16>, vector<9x128xbf16>, vector<32x128xf32> -> vector<32x128xf32>
    %c0_3 = arith.constant 0 : index
    %c0_4 = arith.constant 0 : index
    %3 = vector.load %arg3[%c0_3, %c0_4] : memref<32x1xf32, #tpu.memory_space<vmem>>, vector<32x1xf32>
    %4 = vector.broadcast %3 : vector<32x1xf32> to vector<32x128xf32>
    %5 = arith.addf %2, %4 : vector<32x128xf32>
    %6 = arith.negf %5 : vector<32x128xf32>
    %7 = math.exp %6 : vector<32x128xf32>
    %cst_5 = arith.constant 1.000000e+00 : f32
    %8 = vector.broadcast %cst_5 : f32 to vector<32x128xf32>
    %9 = arith.addf %8, %7 : vector<32x128xf32>
    %10 = arith.divf %8, %9 : vector<32x128xf32>
    %11 = arith.truncf %10 : vector<32x128xf32> to vector<32x128xbf16>
    %c0_6 = arith.constant 0 : index
    %c0_7 = arith.constant 0 : index
    %12 = vector.load %arg4[%c0_6, %c0_7] : memref<32x128xbf16, #tpu.memory_space<vmem>>, vector<32x128xbf16>
    tpu.vector_store %arg4[%c0_6, %c0_7], %11 {strides = array<i32>} : memref<32x128xbf16, #tpu.memory_space<vmem>>, vector<32x128xbf16>,
    return
  }
  func.func @transform_0(%arg0: i32) -> (i32, i32) {
    %c0_i32 = arith.constant 0 : i32
    %c0_i32_0 = arith.constant 0 : i32
    return %c0_i32, %arg0 : i32, i32
  }
  func.func @transform_1(%arg0: i32) -> (i32, i32) {
    %c0_i32 = arith.constant 0 : i32
    %c0_i32_0 = arith.constant 0 : i32
    %c0_i32_1 = arith.constant 0 : i32
    return %c0_i32, %c0_i32_0 : i32, i32
  }
  func.func @transform_2(%arg0: i32) -> (i32, i32) {
    %c0_i32 = arith.constant 0 : i32
    %c0_i32_0 = arith.constant 0 : i32
    %c0_i32_1 = arith.constant 0 : i32
    return %c0_i32, %c0_i32_0 : i32, i32
  }
  func.func @transform_3(%arg0: i32) -> (i32, i32) {
    %c0_i32 = arith.constant 0 : i32
    %c0_i32_0 = arith.constant 0 : i32
    return %c0_i32, %arg0 : i32, i32
  }
}

</mosaic_0001>

<bundles_post_ra>
// kernel: tpu_custom_call.1
= control target key start
LH: loop header
LB: loop body
LE: loop exit
PB: predicated region body
PF: predicated region fallthrough
CT: control target
= control target key end

     0   :  { %vm68_vm0 = vcmask 1043456   ;;  %vm69_vm1 = vcmask 1044480   ;;  %v271_v2 = vmov 65535   ;;  %vm61_vm2 = vcmask 72704   ;;  %s331_s0 = inlined_call_operand.vmem [shape: bf16[9,128], index: 0, kind: input, shape index: {}]   ;;  %s332_s1 = inlined_call_operand.vmem [shape: bf16[32,9], index: 1, kind: input, shape index: {}]   ;;  %s333_s2 = inlined_call_operand.vmem [shape: f32[32,1], index: 2, kind: input, shape index: {}]   ;;  %s334_s3 = inlined_call_operand.hbm [shape: bf16[32,128], index: 3, kind: output, shape index: {}]  }
   0x1   :  { %v228_v0 = vld [vmem:[%s331_s0] sm:$0x1f]   ;;  %v70_v3 = vsel %vm68_vm0, 4294967295, %v271_v2  ;;  %v24_v5 = vld [vmem:[%s333_s2 + $0x10] sm:$0xff]  ;;  %v272_v7 = vmov 0  }
   0x2   :  { %v229_v1 = vld [vmem:[%s332_s1] sm:$0xff]   ;;  %v71_v4 = vsel %vm69_vm1, %v70_v3, 0  ;;  %227 = vset.pattern.permute.xlu1 %v272_v7  ;;  %226 = vset.pattern.permute.xlu0 %v272_v7 }
   0x3   :  { %217 = vmatprep.mubr.msk.bf16.mxu0 %vm61_vm2, %v229_v1  ;;  %v73_v6 = vand.u32 %v228_v0, %v71_v4  ;;  %v22_v8 = vld [vmem:[%s333_s2] sm:$0xff]  ;;  %38 = vperm.xlu1 %227, %v24_v5  }
   0x4   :  { %28 = vperm.xlu0 %226, %v22_v8  }
   0x5   :  { %8 = vsyncpa [#allocation3], 0  ;;  %215 = vmatprep.subr.bf16.mxu0 %v73_v6  ;;  %v230_v9 = vld [vmem:[%s332_s1 + $0x8] sm:$0xff]   ;;  %v25_v10 = vld [vmem:[%s333_s2 + $0x18] sm:$0xff]  ;;  %s273_s1 = smov [#allocation2]  }
   0x6   :  { %v23_v11 = vld [vmem:[%s333_s2 + $0x8] sm:$0xff]  ;;  %216 = vmatpush3.bf16.msra.mxu0 %v73_v6  ;;  %s173_s2 = sshll.u32 %s273_s1, 4  ;;  %s174_s2 = int_to_ptr.vmem [resolvable:$true] %s173_s2 }
   0x7   :  { %43 = vperm.xlu1 %227, %v25_v10   ;;  %s247_s25 = scalar_lea.vmem %s174_s2, 256  ;;  %p252_p1 = scmp.lt.s32.totalorder %s174_s2, %s174_s2 }
   0x8   :  { %33 = vperm.xlu0 %226, %v23_v11   ;;  %p248_p0 = scmp.ne.s32.totalorder %s174_s2, %s247_s25  ;;  %p253_p2 = scmp.lt.s32.totalorder %s247_s25, %s247_s25 }
   0x9   :  { %218 = vmatmul.mubr.msk.bf16.vlgmr.msra.gmra.mrb[0].mxu0 %vm61_vm2, %v230_v9 }
   0xa   :  { %p254_p3 = por %p253_p2, %p252_p1 }
   0xc   :  { %p255_p4 = pnand %p254_p3, %p248_p0 }
  0x82   :  { %v39_v12 = vpop.permute.xlu1 %38 }
  0x83   :  { %v29_v13 = vpop.permute.xlu0 %28 }
  0x86   :  { %v44_v17 = vpop.permute.xlu1 %43 }
  0x87   :  { %v34_v20 = vpop.permute.xlu0 %33 }
  0xdc   :  { %v219_v14 = vpop.f32.mrb[0].mxu0 }
  0xdd   :  { %v118_v15 = vadd.f32 %v219_v14, %v39_v12  ;;  %v109_v16 = vpop.f32.mrb[1].mxu0 }
  0xde   :  { %v110_v18 = vadd.f32 %v109_v16, %v29_v13  ;;  %v220_v19 = vpop.f32.mrb[2].mxu0 }
  0xdf   :  { %v191_v21 = vmul.f32 -1.442695, %v118_v15  ;;  %v121_v22 = vadd.f32 %v220_v19, %v44_v17  ;;  %v112_v23 = vpop.f32.mrb[3].mxu0 }
  0xe0   :  { %v189_v24 = vmul.f32 -1.442695, %v110_v18  ;;  %v113_v25 = vadd.f32 %v112_v23, %v34_v20 }
  0xe1   :  { %231 = vpow2.f32 %v191_v21  ;;  %v192_v26 = vmul.f32 -1.442695, %v121_v22 }
  0xe2   :  { %233 = vpow2.f32 %v189_v24  ;;  %v190_v27 = vmul.f32 -1.442695, %v113_v25 }
  0xe3   :  { %235 = vpow2.f32 %v192_v26 }
  0xe4   :  { %237 = vpow2.f32 %v190_v27 }
  0xeb   :  { %v232_v28 = vpop.eup %231 }
  0xec   :  { %v234_v29 = vpop.eup %233  ;;  %v138_v30 = vadd.f32 1.0, %v232_v28 }
  0xed   :  { %v236_v31 = vpop.eup %235  ;;  %v136_v32 = vadd.f32 1.0, %v234_v29 }
  0xee   :  { %v238_v33 = vpop.eup %237  ;;  %239 = vrcp.f32 %v138_v30  ;;  %v139_v34 = vadd.f32 1.0, %v236_v31 }
  0xef   :  { %241 = vrcp.f32 %v136_v32  ;;  %v137_v35 = vadd.f32 1.0, %v238_v33 }
  0xf0   :  { %243 = vrcp.f32 %v139_v34 }
  0xf1   :  { %245 = vrcp.f32 %v137_v35 }
  0xf8   :  { %v240_v36 = vpop.eup %239 }
  0xf9   :  { %v242_v37 = vpop.eup %241 }
  0xfa   :  { %v244_v38 = vpop.eup %243 }
  0xfb   :  { %v246_v39 = vpop.eup %245  ;;  %v209_v40 = vpack.c.bf16 %v244_v38, %v240_v36 }
  0xfc   :  { %v204_v41 = vpack.c.bf16 %v246_v39, %v242_v37 }
  0xfd   :  { %211 = vst [vmem:[#allocation2 + $0x8] sm:$0xff] %v209_v40  }
  0xfe   :  { %205 = vst [vmem:[#allocation2] sm:$0xff] %v204_v41  }
  0xff   :  { %258 = shalt.err (!%p255_p4)
}
 0x100   :  { %s259_s28 = scalar_lea.hbm %s334_s3, 256 }
 0x101   :  { %p260_p5 = scmp.ne.s32.totalorder %s334_s3, %s259_s28  ;;  %p263_p6 = scmp.lt.u32.totalorder %s259_s28, %s334_s3 }
 0x103   :  { %p265_p7 = pnand %p263_p6, %p260_p5 }
 0x105   :  { %268 = shalt.err (!%p265_p7)
}
 0x106   :  { %s274_s6 = smov 64   ;;  %s275_s7 = smov 4  }
 0x107   :  { %179 = dma.vmem_to_hbm [thread:$0]  %s174_s2, 256, %s334_s3, [#allocation3], %s274_s6, %s274_s6, %s275_s7  }
 0x108   :  { %269 = dma.done.wait [#allocation3], 256  }
 0x109   :  { %270 = vsyncadd [#allocation3], 4294967040 }
 0x10a   :  { %183 = vsyncpa [#allocation3], 1 }

</bundles_post_ra>
